<compile_context>
chip_gen: v6e
topology: v6e:2x2x1
jax: 0.10.0
libtpu: 0.0.40
codegen_flags: <defaults>
</compile_context>

<pallas_src>
import functools

import jax
import jax.numpy as jnp
from jax.experimental import pallas as pl
from jax.experimental.pallas import tpu as pltpu

LANE = 128      # feature-axis padding target (full vreg lane width)
ROW_TILE = 16   # batch-tile granularity (bf16 sublane tile; also a multiple of 8 for f32)


def _cdiv(a, b):
    return (a + b - 1) // b


def _round_up(x, m):
    return ((x + m - 1) // m) * m


def _pad_to(a, shape):
    return jnp.pad(a, [(0, t - s) for s, t in zip(a.shape, shape)])


def _block_vmem_bytes(shape, dtype):
    """VMEM footprint of one block, including sublane/lane tile padding."""
    itemsize = jnp.dtype(dtype).itemsize
    sub = {4: 8, 2: 16, 1: 32}.get(itemsize, 8)
    rows = shape[0] if len(shape) > 1 else 1
    cols = shape[-1]
    return _round_up(rows, sub) * _round_up(cols, LANE) * itemsize


def _vae_feat_kernel(x_ref, w1_ref, b1_ref, w2_ref, b2_ref, wr_ref, o_ref, *, k_in):
    x = x_ref[...]                                   # (bm, 2L+1) bf16 (packed activations)
    # First layer: single K=2L MXU pass, f32 accumulate, f32 epilogue (bias + ReLU).
    h = jnp.dot(x[:, :k_in], w1_ref[...], preferred_element_type=jnp.float32) + b1_ref[...]
    h = jnp.maximum(h, 0.0)
    # Second layer.
    y = jnp.dot(h.astype(jnp.bfloat16), w2_ref[...],
                preferred_element_type=jnp.float32) + b2_ref[...]
    # Recon branch: Linear(1, H) == rank-1 broadcast multiply (br already folded into b2).
    r = x[:, k_in:k_in + 1].astype(jnp.float32) * wr_ref[...]     # (bm,1)*(1,Hp) -> (bm,Hp)
    o_ref[...] = (y + r).astype(o_ref.dtype)


def vae_feature_processor(recon_error, mu, log_var, params, hidden_dim, *,
                          batch_tile=1024, min_grid_steps=2,
                          out_dtype=jnp.float32):
    """Fused VAEFeatureProcessor forward.

    params: dict with
      w1 (2L, Hp) bf16, b1 (1, Hp) f32, w2 (Hp, Hp) bf16, b2_br (1, Hp) f32, wr (1, Hp) f32
    where Hp = round_up(hidden_dim, 128) and br is pre-folded into b2_br.
    """
    B, L = mu.shape
    Hp = params["w2"].shape[1]
    Kx = 2 * L + 1                                   # packed activation width

    # Batch tile: minimal tail padding, >= min_grid_steps steps (megacore on v7x).
    num_steps = max(_cdiv(B, max(batch_tile, ROW_TILE)), min_grid_steps)
    bm = max(_round_up(_cdiv(B, num_steps), ROW_TILE), ROW_TILE)
    Bp = _round_up(B, bm)
    grid = (Bp // bm,)

    # One lane-dense streamed input: [mu | log_var | recon_error] in bf16.
    x = jnp.concatenate([mu, log_var, recon_error], axis=1).astype(jnp.bfloat16)
    if Bp != B:                                      # zero-pad ragged tail (inert rows)
        x = _pad_to(x, (Bp, Kx))

    # Resident weights: single-buffer only when residency is actually big (large Hp),
    # keeping the default (tested) double-buffered path at small Hp.
    weight_mode = pl.Buffered(1) if Hp >= 2048 else None

    def resident(shape):
        if weight_mode is None:
            return pl.BlockSpec(shape, lambda i: (0, 0))
        return pl.BlockSpec(shape, lambda i: (0, 0), pipeline_mode=weight_mode)

    # Generation-aware VMEM limit derived from the real per-step footprint.
    try:
        vmem_cap = int(pltpu.get_tpu_info().vmem_capacity_bytes)
    except Exception:
        vmem_cap = 64 << 20                          # conservative (v7x per-TC)
    streamed = 2 * (_block_vmem_bytes((bm, Kx), jnp.bfloat16)
                    + _block_vmem_bytes((bm, Hp), out_dtype))
    n_wbufs = 1 if weight_mode is not None else 2
    resident_bytes = n_wbufs * (
        _block_vmem_bytes(params["w1"].shape, jnp.bfloat16)
        + _block_vmem_bytes(params["w2"].shape, jnp.bfloat16)
        + _block_vmem_bytes(params["b1"].shape, jnp.float32)
        + _block_vmem_bytes(params["b2_br"].shape, jnp.float32)
        + _block_vmem_bytes(params["wr"].shape, jnp.float32))
    vmem_limit = int(min(max(2 * (streamed + resident_bytes) + (4 << 20), 32 << 20),
                         int(0.9 * vmem_cap)))

    out_bytes = jnp.dtype(out_dtype).itemsize
    flops = 2 * Bp * (2 * L * Hp + Hp * Hp) + 2 * Bp * Hp
    bytes_accessed = (Bp * Kx * 2                    # packed bf16 activations
                      + Bp * Hp * out_bytes          # output writeback
                      + (2 * L * Hp + Hp * Hp) * 2   # bf16 weights
                      + 3 * Hp * 4)                  # f32 biases / wr

    out = pl.pallas_call(
        functools.partial(_vae_feat_kernel, k_in=2 * L),
        out_shape=jax.ShapeDtypeStruct((Bp, Hp), out_dtype),
        grid=grid,
        in_specs=[
            pl.BlockSpec((bm, Kx), lambda i: (i, 0)),     # streamed packed activations
            resident(params["w1"].shape),
            resident(params["b1"].shape),
            resident(params["w2"].shape),
            resident(params["b2_br"].shape),
            resident(params["wr"].shape),
        ],
        out_specs=pl.BlockSpec((bm, Hp), lambda i: (i, 0)),
        compiler_params=pltpu.CompilerParams(
            dimension_semantics=("parallel",),            # megacore sharding on v7x
            vmem_limit_bytes=vmem_limit,
        ),
        cost_estimate=pl.CostEstimate(
            flops=flops, transcendentals=0, bytes_accessed=bytes_accessed),
    )(x, params["w1"], params["b1"], params["w2"], params["b2_br"], params["wr"])

    if Bp == B and Hp == hidden_dim:
        return out                                        # no slice copy
    return out[:B, :hidden_dim]


def init_params(latent_dim, hidden_dim, key):
    """PyTorch-Linear-style uniform init.

    Returns (kernel_params, ref_params): kernel_params are padded/bf16 (and br-folded)
    for the Pallas kernel; ref_params are the original f32 weights for the reference.
    """
    k1, k2, k3, k4, k5, k6 = jax.random.split(key, 6)
    in1 = 2 * latent_dim
    b1b = 1.0 / (in1 ** 0.5)
    b2b = 1.0 / (hidden_dim ** 0.5)
    brb = 1.0

    # Logical (pre-transposed to (in, out)) f32 parameters.
    w1 = jax.random.uniform(k1, (in1, hidden_dim), jnp.float32, -b1b, b1b)
    b1 = jax.random.uniform(k2, (1, hidden_dim), jnp.float32, -b1b, b1b)
    w2 = jax.random.uniform(k3, (hidden_dim, hidden_dim), jnp.float32, -b2b, b2b)
    b2 = jax.random.uniform(k4, (1, hidden_dim), jnp.float32, -b2b, b2b)
    wr = jax.random.uniform(k5, (1, hidden_dim), jnp.float32, -brb, brb)
    br = jax.random.uniform(k6, (1, hidden_dim), jnp.float32, -brb, brb)
    ref = {"w1": w1, "b1": b1, "w2": w2, "b2": b2, "wr": wr, "br": br}

    # Kernel params: fold br into b2, zero-pad hidden to LANE (and no further), bf16 weights.
    Hp = _round_up(hidden_dim, LANE)
    kernel_params = {
        "w1": _pad_to(w1, (in1, Hp)).astype(jnp.bfloat16),
        "b1": _pad_to(b1, (1, Hp)),
        "w2": _pad_to(w2, (Hp, Hp)).astype(jnp.bfloat16),
        "b2_br": _pad_to(b2 + br, (1, Hp)),
        "wr": _pad_to(wr, (1, Hp)),
    }
    return kernel_params, ref


def _reference(recon_error, mu, log_var, p):
    x = jnp.concatenate([mu, log_var], axis=1)
    h = jnp.maximum(x @ p["w1"] + p["b1"], 0.0)
    y = h @ p["w2"] + p["b2"]
    r = recon_error @ p["wr"] + p["br"]
    return y + r


if __name__ == "__main__":
    latent_dim, hidden_dim, batch = 16, 32, 20
    batch_tile = 1024   # tile selection still forces >=2 grid steps (megacore) at B=20

    key = jax.random.PRNGKey(0)
    kp, ka, kb, kc = jax.random.split(key, 4)

    params, ref_params = init_params(latent_dim, hidden_dim, kp)
    mu = jax.random.normal(ka, (batch, latent_dim), jnp.float32)
    log_var = jax.random.normal(kb, (batch, latent_dim), jnp.float32)
    recon_error = jax.random.normal(kc, (batch, 1), jnp.float32)

    fwd = jax.jit(functools.partial(vae_feature_processor,
                                    hidden_dim=hidden_dim,
                                    batch_tile=batch_tile))
    out = fwd(recon_error, mu, log_var, params)
    jax.block_until_ready(out)

    ref = _reference(recon_error, mu, log_var, ref_params)
    assert out.shape == (batch, hidden_dim), out.shape
    max_err = float(jnp.max(jnp.abs(out - ref)))
    # bf16 MXU operands / packed bf16 activations loosen tolerance vs pure-f32 reference.
    assert jnp.allclose(out, ref, atol=3e-2, rtol=3e-2), f"mismatch vs reference ({max_err})"

    print("KERNEL_OK")
</pallas_src>

<mosaic_0001>
module attributes {stable_mosaic.version = 11 : i64} {
  func.func @_vae_feat_kernel(%arg0: i32, %arg1: memref<16x33xbf16, #tpu.memory_space<vmem>>, %arg2: memref<32x128xbf16, #tpu.memory_space<vmem>>, %arg3: memref<1x128xf32, #tpu.memory_space<vmem>>, %arg4: memref<128x128xbf16, #tpu.memory_space<vmem>>, %arg5: memref<1x128xf32, #tpu.memory_space<vmem>>, %arg6: memref<1x128xf32, #tpu.memory_space<vmem>>, %arg7: memref<16x128xf32, #tpu.memory_space<vmem>>) attributes {dimension_semantics = [#tpu.dimension_semantics<parallel>], iteration_bounds = array<i64: 2>, scalar_prefetch = 0 : i64, scratch_operands = 0 : i64, tpu.core_type = #tpu.core_type<tc>, window_params = [{transform_indices = @transform_0, window_bounds = array<i64: 16, 33>}, {pipeline_mode = #tpu.pipeline_mode<synchronous>, transform_indices = @transform_1, window_bounds = array<i64: 32, 128>}, {pipeline_mode = #tpu.pipeline_mode<synchronous>, transform_indices = @transform_2, window_bounds = array<i64: 1, 128>}, {pipeline_mode = #tpu.pipeline_mode<synchronous>, transform_indices = @transform_3, window_bounds = array<i64: 128, 128>}, {pipeline_mode = #tpu.pipeline_mode<synchronous>, transform_indices = @transform_4, window_bounds = array<i64: 1, 128>}, {pipeline_mode = #tpu.pipeline_mode<synchronous>, transform_indices = @transform_5, window_bounds = array<i64: 1, 128>}, {transform_indices = @transform_6, window_bounds = array<i64: 16, 128>}]} {
    %c0 = arith.constant 0 : index
    %c0_0 = arith.constant 0 : index
    %0 = vector.load %arg1[%c0, %c0_0] : memref<16x33xbf16, #tpu.memory_space<vmem>>, vector<16x33xbf16>
    %1 = vector.extract_strided_slice %0 {offsets = [0, 0], sizes = [16, 32], strides = [1, 1]} : vector<16x33xbf16> to vector<16x32xbf16>
    %c0_1 = arith.constant 0 : index
    %c0_2 = arith.constant 0 : index
    %2 = vector.load %arg2[%c0_1, %c0_2] : memref<32x128xbf16, #tpu.memory_space<vmem>>, vector<32x128xbf16>
    %cst = arith.constant dense<0.000000e+00> : vector<16x128xf32>
    %3 = tpu.matmul %1, %2, %cst {dimension_numbers = #tpu.dot_dimension_numbers<[1], [0], [0], [1], [0, 0, 1, 1], [], []>} : vector<16x32xbf16>, vector<32x128xbf16>, vector<16x128xf32> -> vector<16x128xf32>
    %c0_3 = arith.constant 0 : index
    %c0_4 = arith.constant 0 : index
    %4 = vector.load %arg3[%c0_3, %c0_4] : memref<1x128xf32, #tpu.memory_space<vmem>>, vector<1x128xf32>
    %5 = vector.broadcast %4 : vector<1x128xf32> to vector<16x128xf32>
    %6 = arith.addf %3, %5 : vector<16x128xf32>
    %cst_5 = arith.constant 0.000000e+00 : f32
    %7 = vector.broadcast %cst_5 : f32 to vector<16x128xf32>
    %8 = arith.maximumf %6, %7 : vector<16x128xf32>
    %9 = arith.truncf %8 : vector<16x128xf32> to vector<16x128xbf16>
    %c0_6 = arith.constant 0 : index
    %c0_7 = arith.constant 0 : index
    %10 = vector.load %arg4[%c0_6, %c0_7] : memref<128x128xbf16, #tpu.memory_space<vmem>>, vector<128x128xbf16>
    %cst_8 = arith.constant dense<0.000000e+00> : vector<16x128xf32>
    %11 = tpu.matmul %9, %10, %cst_8 {dimension_numbers = #tpu.dot_dimension_numbers<[1], [0], [0], [1], [0, 0, 1, 1], [], []>} : vector<16x128xbf16>, vector<128x128xbf16>, vector<16x128xf32> -> vector<16x128xf32>
    %c0_9 = arith.constant 0 : index
    %c0_10 = arith.constant 0 : index
    %12 = vector.load %arg5[%c0_9, %c0_10] : memref<1x128xf32, #tpu.memory_space<vmem>>, vector<1x128xf32>
    %13 = vector.broadcast %12 : vector<1x128xf32> to vector<16x128xf32>
    %14 = arith.addf %11, %13 : vector<16x128xf32>
    %15 = vector.extract_strided_slice %0 {offsets = [0, 32], sizes = [16, 1], strides = [1, 1]} : vector<16x33xbf16> to vector<16x1xbf16>
    %16 = arith.extf %15 : vector<16x1xbf16> to vector<16x1xf32>
    %c0_11 = arith.constant 0 : index
    %c0_12 = arith.constant 0 : index
    %17 = vector.load %arg6[%c0_11, %c0_12] : memref<1x128xf32, #tpu.memory_space<vmem>>, vector<1x128xf32>
    %18 = vector.broadcast %16 : vector<16x1xf32> to vector<16x128xf32>
    %19 = vector.broadcast %17 : vector<1x128xf32> to vector<16x128xf32>
    %20 = arith.mulf %18, %19 : vector<16x128xf32>
    %21 = arith.addf %14, %20 : vector<16x128xf32>
    %c0_13 = arith.constant 0 : index
    %c0_14 = arith.constant 0 : index
    %22 = vector.load %arg7[%c0_13, %c0_14] : memref<16x128xf32, #tpu.memory_space<vmem>>, vector<16x128xf32>
    tpu.vector_store %arg7[%c0_13, %c0_14], %21 {strides = array<i32>} : memref<16x128xf32, #tpu.memory_space<vmem>>, vector<16x128xf32>,
    return
  }
  func.func @transform_0(%arg0: i32) -> (i32, i32) {
    %c0_i32 = arith.constant 0 : i32
    %c0_i32_0 = arith.constant 0 : i32
    return %arg0, %c0_i32 : i32, i32
  }
  func.func @transform_1(%arg0: i32) -> (i32, i32) {
    %c0_i32 = arith.constant 0 : i32
    %c0_i32_0 = arith.constant 0 : i32
    %c0_i32_1 = arith.constant 0 : i32
    return %c0_i32, %c0_i32_0 : i32, i32
  }
  func.func @transform_2(%arg0: i32) -> (i32, i32) {
    %c0_i32 = arith.constant 0 : i32
    %c0_i32_0 = arith.constant 0 : i32
    %c0_i32_1 = arith.constant 0 : i32
    return %c0_i32, %c0_i32_0 : i32, i32
  }
  func.func @transform_3(%arg0: i32) -> (i32, i32) {
    %c0_i32 = arith.constant 0 : i32
    %c0_i32_0 = arith.constant 0 : i32
    %c0_i32_1 = arith.constant 0 : i32
    return %c0_i32, %c0_i32_0 : i32, i32
  }
  func.func @transform_4(%arg0: i32) -> (i32, i32) {
    %c0_i32 = arith.constant 0 : i32
    %c0_i32_0 = arith.constant 0 : i32
    %c0_i32_1 = arith.constant 0 : i32
    return %c0_i32, %c0_i32_0 : i32, i32
  }
  func.func @transform_5(%arg0: i32) -> (i32, i32) {
    %c0_i32 = arith.constant 0 : i32
    %c0_i32_0 = arith.constant 0 : i32
    %c0_i32_1 = arith.constant 0 : i32
    return %c0_i32, %c0_i32_0 : i32, i32
  }
  func.func @transform_6(%arg0: i32) -> (i32, i32) {
    %c0_i32 = arith.constant 0 : i32
    %c0_i32_0 = arith.constant 0 : i32
    return %arg0, %c0_i32 : i32, i32
  }
}

</mosaic_0001>

<bundles_post_ra>
// kernel: vae_feature_processor.1
= control target key start
LH: loop header
LB: loop body
LE: loop exit
PB: predicated region body
PF: predicated region fallthrough
CT: control target
= control target key end

     0   :  { %s668_s21 = smov 0   ;;  %s728_s0 = inlined_call_operand.vmem [shape: bf16[32,33], index: 0, kind: input, shape index: {}]   ;;  %s729_s1 = inlined_call_operand.vmem [shape: bf16[32,128], index: 1, kind: input, shape index: {}]   ;;  %s730_s2 = inlined_call_operand.vmem [shape: f32[1,128], index: 2, kind: input, shape index: {}]   ;;  %s731_s3 = inlined_call_operand.vmem [shape: bf16[128,128], index: 3, kind: input, shape index: {}]   ;;  %s732_s4 = inlined_call_operand.vmem [shape: f32[1,128], index: 4, kind: input, shape index: {}]   ;;  %s733_s5 = inlined_call_operand.vmem [shape: f32[1,128], index: 5, kind: input, shape index: {}]   ;;  %s734_s6 = inlined_call_operand.vmem [shape: f32[32,128], index: 6, kind: output, shape index: {}]  }
   0x1 LB: > { %s527_s22 = sadd.s32 4294967295, %s628_s21   ;;  %p531_p0 = scmp.ge.s32.totalorder %s628_s21, 1  ;;  %s628_s21 = sphi %s668_s21, %s16_s21  }
   0x2   : > { %p213_p1 = scmp.lt.s32.totalorder %s628_s21, 3 }
   0x4   : > { %p214_p2 = pnand %p531_p0, %p213_p1 }
   0x5   : > { %s532_s27 = sshll.u32 (!%p214_p2), %s527_s22, 1 }
   0x6   : > { %217 = sbr.rel (%p214_p2) target bundleno = 425 (0x1a9), region = 44  ;;  %p244_p3 = scmp.lt.s32.totalorder (!%p214_p2), %s532_s27, 3 }
   0xb   : > { %v610_v0 = vld [vmem:[%s729_s1 + $0x8] sm:$0xff]   ;;  %v630_v1 = vmov 0.0   ;;  %v611_v2 = vld [vmem:[%s729_s1] sm:$0xff]   ;;  %vm631_vm0 = vmmov 0   ;;  %v613_v3 = vld [vmem:[%s731_s3 + $0x38] sm:$0xff]   ;;  %s736_s27 = smov (!%p244_p3, %s532_s27), 3 }
   0xc   : > { %565 = vmatprep.subr.bf16.mxu0 %v630_v1  ;;  %573 = vmatprep.subr.bf16.mxu1 %v630_v1  ;;  %v614_v4 = vld [vmem:[%s731_s3 + $0x30] sm:$0xff]   ;;  %s533_s8 = sshll.u32 %s736_s27, 2  ;;  %v615_v5 = vld [vmem:[%s731_s3 + $0x28] sm:$0xff]   ;;  %vm286_vm1 = vcmask 261120   ;;  %v616_v7 = vld [vmem:[%s731_s3 + $0x20] sm:$0xff]   ;;  %v632_v14 = vmov 32  }
   0xd   : > { %566 = vmatpush3.bf16.msra.mxu0 %v610_v0  ;;  %569 = vmatprep.mubr.msk.bf16.mxu0 %vm631_vm0, %v630_v1  ;;  %s247_s13 = scalar_lea.vmem %s728_s0, %s533_s8  ;;  %v617_v8 = vld [vmem:[%s731_s3 + $0x18] sm:$0xff]   ;;  %v618_v9 = vld [vmem:[%s731_s3 + $0x10] sm:$0xff]   ;;  %v619_v10 = vld [vmem:[%s731_s3 + $0x8] sm:$0xff]   ;;  %s535_s8 = sshll.u32 %s736_s27, 3 }
   0xe   : > { %567 = vmatprep.subr.bf16.mxu0 %v630_v1  ;;  %589 = vmatprep.mubr.msk.bf16.mxu1 %vm631_vm0, %v630_v1  ;;  %v256_v6 = vld [vmem:[%s247_s13] sm:$0xff]   ;;  %s253_s11 = scalar_lea.vmem %s734_s6, %s535_s8 }
   0xf   : > { %574 = vmatpush3.bf16.msra.mxu1 %v613_v3  ;;  %v620_v11 = vld [vmem:[%s731_s3] sm:$0xff]   ;;  %v446_v12 = vunpack.c.l.bf16 %v256_v6  ;;  %v447_v13 = vunpack.c.h.bf16 %v256_v6  ;;  %604 = vset.pattern.permute.xlu0 %v632_v14 }
  0x10   : > { %575 = vmatprep.subr.bf16.mxu1 %v630_v1  ;;  %v536_v16 = vld [vmem:[%s730_s2] ss:$0 sm:$0xff] }
  0x11   : > { %568 = vmatpush3.bf16.msra.mxu0 %v611_v2  ;;  %v605_v15 = vpack.i.bf16 %v447_v13, %v446_v12  ;;  %v550_v28 = vld [vmem:[%s733_s5] ss:$0 sm:$0xff] }
  0x12   : > { %v541_v29 = vld [vmem:[%s732_s4] ss:$0 sm:$0xff] }
  0x13   : > { %576 = vmatpush3.bf16.msra.mxu1 %v614_v4  ;;  %606 = vperm.xlu0 %604, %v605_v15  }
  0x14   : > { %577 = vmatprep.subr.bf16.mxu1 %v630_v1  ;;  %570 = vmatmul.mubr.msk.bf16.vlgmr.msra.gmra.mxu0 %vm286_vm1, %v256_v6 }
  0x17   : > { %578 = vmatpush3.bf16.msra.mxu1 %v615_v5 }
  0x18   : > { %579 = vmatprep.subr.bf16.mxu1 %v630_v1 }
  0x1b   : > { %580 = vmatpush3.bf16.msra.mxu1 %v616_v7 }
  0x1c   : > { %581 = vmatprep.subr.bf16.mxu1 %v630_v1 }
  0x1f   : > { %582 = vmatpush3.bf16.msra.mxu1 %v617_v8 }
  0x20   : > { %583 = vmatprep.subr.bf16.mxu1 %v630_v1 }
  0x23   : > { %584 = vmatpush3.bf16.msra.mxu1 %v618_v9 }
  0x24   : > { %585 = vmatprep.subr.bf16.mxu1 %v630_v1 }
  0x27   : > { %586 = vmatpush3.bf16.msra.mxu1 %v619_v10 }
  0x28   : > { %587 = vmatprep.subr.bf16.mxu1 %v630_v1 }
  0x2b   : > { %588 = vmatpush3.bf16.msra.mxu1 %v620_v11 }
  0x8e   : > { %v607_v26 = vpop.permute.xlu0 %606 }
  0x8f   : > { %v608_v27 = vunpack.i.l.bf16 %v607_v26  ;;  %v609_v30 = vunpack.i.h.bf16 %v607_v26 }
  0x91   : > { %v465_v31 = vmul.f32 %v608_v27, %v550_v28  ;;  %v466_v35 = vmul.f32 %v609_v30, %v550_v28 }
  0xd4   : > { %v324_v17 = vpop.f32.mrf.mxu0 }
  0xd5   : > { %v325_v19 = vadd.f32 %v536_v16, %v324_v17 }
  0xd6   : > { %v571_v18 = vpop.f32.mrf.mxu0 }
  0xd7   : > { %v331_v23 = vmax.f32 %v325_v19, 0.0 }
  0xd8   : > { %v327_v20 = vpop.f32.mrf.mxu0 }
  0xd9   : > { %v328_v21 = vadd.f32 %v536_v16, %v327_v20 }
  0xda   : > { %v572_v22 = vpop.f32.mrf.mxu0 }
  0xdb   : > { %v332_v24 = vmax.f32 %v328_v21, 0.0 }
  0xdd   : > { %v333_v25 = vpack.c.bf16 %v332_v24, %v331_v23 }
  0xdf   : > { %590 = vmatmul.mubr.bf16.vlgmr.msra.gmra.mxu1 %v333_v25 }
 0x19f   : > { %v439_v32 = vpop.f32.mrf.mxu1 }
 0x1a0   : > { %v440_v33 = vadd.f32 %v541_v29, %v439_v32 }
 0x1a1   : > { %v591_v34 = vpop.f32.mrf.mxu1 }
 0x1a2   : > { %v467_v36 = vadd.f32 %v465_v31, %v440_v33 }
 0x1a3   : > { %v442_v37 = vpop.f32.mrf.mxu1 }
 0x1a4   : > { %469 = vst [vmem:[%s253_s11] sm:$0xff] %v467_v36  ;;  %v443_v38 = vadd.f32 %v541_v29, %v442_v37 }
 0x1a5   : > { %v592_v39 = vpop.f32.mrf.mxu1 }
 0x1a6   : > { %v468_v40 = vadd.f32 %v466_v35, %v443_v38 }
 0x1a8   : > { %470 = vst [vmem:[%s253_s11 + $0x8] sm:$0xff] %v468_v40 }
 0x1a9 PF: > { %s16_s21 = sadd.s32 1, %s628_s21  }
 0x1aa   : > { %p13_p4 = scmp.ge.s32.totalorder %s16_s21, 4  }
 0x1ac   :  { %15 = sbr.rel (!%p13_p4) target bundleno = 1 (0x1), region = 74 }

</bundles_post_ra>
